<compile_context>
chip_gen: v7x
topology: tpu7x:2x2x1
jax: 0.10.0
libtpu: 0.0.40
codegen_flags: <defaults>
</compile_context>

<pallas_src>
import jax
import jax.numpy as jnp
from jax import lax
from jax.experimental import pallas as pl
from jax.experimental.pallas import tpu as pltpu  # noqa: F401 (TPU backend)

# ------------------------- model dimensions ---------------------------------
LAYERS = (128, 64, 32)          # layers[0] != layers[-1] -> encoder = LAYERS,
                                # decoder = reversed(LAYERS)
D_IN, D_HID, D_LAT = LAYERS
LANES = 128                     # vreg lane width
BATCH = 16
MXU_DTYPE = jnp.bfloat16        # MXU operand dtype; accumulation is always f32

# dot_general dims: contract a.dim1 with b.dim1 (b stored pre-transposed,
# i.e. lane-dense weight, "dot(a, b.T)" MXU pattern).
_CONTRACT_LAST = (((1,), (1,)), ((), ()))


# ----------------------------- kernel ----------------------------------------
def ae_kernel(x_ref, w_big_ref, w_small_ref, bias_ref, o_ref):
    # f32 input -> bf16 MXU operand inside the kernel (VPU pack, free slot).
    x = x_ref[...].astype(MXU_DTYPE)

    # Static slices of the packed weight slabs (zero runtime cost; slice
    # boundaries are multiples of the bf16 (16, 128) VMEM tile).
    we1_t = w_big_ref[:D_HID, :]        # (64, 128) encoder L1, transposed
    wd2 = w_big_ref[D_HID:, :]          # (64, 128) decoder L2
    we2_t = w_small_ref[:D_LAT, :]      # (32, 64)  encoder L2, transposed
    wd1 = w_small_ref[D_LAT:, :]        # (32, 64)  decoder L1

    # Bias slab rows: be1 | be2 | bd1 | bd2 (lane-padded with zeros), f32.
    be1 = bias_ref[0:1, :D_HID]
    be2 = bias_ref[1:2, :D_LAT]
    bd1 = bias_ref[2:3, :D_HID]
    bd2 = bias_ref[3:4, :]

    # ---- encoder: Linear -> ReLU -> Linear -> ReLU (reluout=True) ----
    h = lax.dot_general(x, we1_t, _CONTRACT_LAST,
                        preferred_element_type=jnp.float32) + be1
    h = jnp.maximum(h, 0.0)
    lat = lax.dot_general(h.astype(MXU_DTYPE), we2_t, _CONTRACT_LAST,
                          preferred_element_type=jnp.float32) + be2
    lat = jnp.maximum(lat, 0.0)

    # ---- decoder: Linear -> ReLU -> Linear -> Tanh ----
    d = jnp.dot(lat.astype(MXU_DTYPE), wd1,
                preferred_element_type=jnp.float32) + bd1
    d = jnp.maximum(d, 0.0)
    o = jnp.dot(d.astype(MXU_DTYPE), wd2,
                preferred_element_type=jnp.float32) + bd2
    o = jnp.tanh(o)

    # Single lane-dense (B, 256) output slab: [lat | zero-pad to 128 | out].
    # One unmasked full-width store, one output DMA.
    b = lat.shape[0]
    pad = jnp.zeros((b, LANES - D_LAT), jnp.float32)
    o_ref[...] = jnp.concatenate([lat, pad, o], axis=1).astype(o_ref.dtype)


# ----------------------------- wrapper ---------------------------------------
@jax.jit
def autoencoder_forward(x, w_big, w_small, bias):
    """x: [B, 128] f32; packed params from pack_params().
    Returns (lat [B, 32], out [B, 128]) in f32."""
    B = x.shape[0]

    flops = 2 * B * (D_IN * D_HID + D_HID * D_LAT + D_LAT * D_HID + D_HID * D_IN)
    bytes_accessed = (x.size * 4 + w_big.size * 2 + w_small.size * 2
                      + bias.size * 4 + B * 2 * LANES * 4)

    # Gridless call: total working set (~60 KiB) fits trivially in VMEM on
    # v5e/v6e/v7x, so a single step with single-buffered resident weights is
    # fastest. Reintroduce a batch grid (parallel semantics, >=256-row tiles
    # on v6e/v7x, 128 on v5e) only if the batch grows to hundreds+ of rows.
    packed = pl.pallas_call(
        ae_kernel,
        out_shape=jax.ShapeDtypeStruct((B, 2 * LANES), jnp.float32),
        cost_estimate=pl.CostEstimate(flops=flops,
                                      bytes_accessed=bytes_accessed,
                                      transcendentals=B * D_IN),
    )(x, w_big, w_small, bias)

    return packed[:, :D_LAT], packed[:, LANES:]


# --------------------- deterministic parameter init --------------------------
def init_linear(key, n_in, n_out):
    """Mimic torch.nn.Linear default init (uniform +/- 1/sqrt(n_in)).
    Weight stored as [n_in, n_out] (pre-transposed for x @ W)."""
    kw, kb = jax.random.split(key)
    bound = 1.0 / jnp.sqrt(jnp.float32(n_in))
    w = jax.random.uniform(kw, (n_in, n_out), jnp.float32, -bound, bound)
    b = jax.random.uniform(kb, (1, n_out), jnp.float32, -bound, bound)
    return w, b


def make_params(key):
    enc_dims = LAYERS                       # (128, 64, 32)
    dec_dims = tuple(reversed(LAYERS))      # (32, 64, 128)
    keys = jax.random.split(key, 4)
    return [
        init_linear(keys[0], enc_dims[0], enc_dims[1]),
        init_linear(keys[1], enc_dims[1], enc_dims[2]),
        init_linear(keys[2], dec_dims[0], dec_dims[1]),
        init_linear(keys[3], dec_dims[1], dec_dims[2]),
    ]


def pack_params(params):
    """One-time packing/casting (NOT in the per-call path):
      w_big   (128, 128) bf16 = [we1^T (64,128) ; wd2 (64,128)]
      w_small ( 64,  64) bf16 = [we2^T (32, 64) ; wd1 (32, 64)]
      bias    (  4, 128) f32  = rows be1 | be2 | bd1 | bd2 (lane-padded)"""
    (we1, be1), (we2, be2), (wd1, bd1), (wd2, bd2) = params
    w_big = jnp.concatenate([we1.T, wd2], axis=0).astype(MXU_DTYPE)
    w_small = jnp.concatenate([we2.T, wd1], axis=0).astype(MXU_DTYPE)
    bias = jnp.zeros((4, LANES), jnp.float32)
    bias = bias.at[0, :D_HID].set(be1.reshape(-1))
    bias = bias.at[1, :D_LAT].set(be2.reshape(-1))
    bias = bias.at[2, :D_HID].set(bd1.reshape(-1))
    bias = bias.at[3, :].set(bd2.reshape(-1))
    return jax.device_put(w_big), jax.device_put(w_small), jax.device_put(bias)


# --------------------------- pure-JAX reference -------------------------------
def reference_forward(x, params, dtype=jnp.float32):
    """Pure-JAX reference. dtype=MXU_DTYPE mirrors the kernel's MXU casts;
    dtype=float32 is the exact PyTorch-module semantics."""
    (we1, be1), (we2, be2), (wd1, bd1), (wd2, bd2) = params

    def lin(a, w, b):
        return jnp.dot(a.astype(dtype), w.astype(dtype),
                       preferred_element_type=jnp.float32) + b

    h = jnp.maximum(lin(x, we1, be1), 0.0)
    lat = jnp.maximum(lin(h, we2, be2), 0.0)
    d = jnp.maximum(lin(lat, wd1, bd1), 0.0)
    out = jnp.tanh(lin(d, wd2, bd2))
    return lat, out


if __name__ == "__main__":
    key = jax.random.PRNGKey(0)
    kx, kp = jax.random.split(key)
    x = jax.random.normal(kx, (BATCH, LAYERS[0]), jnp.float32)
    params = make_params(kp)

    # One-time packing/casting of the weights (outside the jitted forward).
    w_big, w_small, bias = pack_params(params)

    lat, out = jax.block_until_ready(autoencoder_forward(x, w_big, w_small, bias))
    assert lat.shape == (BATCH, LAYERS[-1]) and out.shape == (BATCH, LAYERS[0])

    # 1) Tight check vs a reference applying the same bf16 MXU casts.
    lat_r, out_r = reference_forward(x, params, dtype=MXU_DTYPE)
    assert jnp.allclose(lat, lat_r, atol=2e-3, rtol=2e-3)
    assert jnp.allclose(out, out_r, atol=2e-3, rtol=2e-3)

    # 2) Sanity check vs the full-f32 module semantics (bf16 error budget).
    lat_f, out_f = reference_forward(x, params, dtype=jnp.float32)
    assert jnp.allclose(lat, lat_f, atol=1e-1, rtol=1e-1)
    assert jnp.allclose(out, out_f, atol=1e-1, rtol=1e-1)

    print("KERNEL_OK")
</pallas_src>

<mosaic_0001>
module attributes {stable_mosaic.version = 11 : i64} {
  func.func @ae_kernel(%arg0: memref<16x128xf32, #tpu.memory_space<vmem>>, %arg1: memref<128x128xbf16, #tpu.memory_space<vmem>>, %arg2: memref<64x64xbf16, #tpu.memory_space<vmem>>, %arg3: memref<4x128xf32, #tpu.memory_space<vmem>>, %arg4: memref<16x256xf32, #tpu.memory_space<vmem>>) attributes {dimension_semantics = [], scalar_prefetch = 0 : i64, scratch_operands = 0 : i64, tpu.core_type = #tpu.core_type<tc>} {
    %c0 = arith.constant 0 : index
    %c0_0 = arith.constant 0 : index
    %0 = vector.load %arg0[%c0, %c0_0] : memref<16x128xf32, #tpu.memory_space<vmem>>, vector<16x128xf32>
    %1 = arith.truncf %0 : vector<16x128xf32> to vector<16x128xbf16>
    %c0_1 = arith.constant 0 : index
    %c0_2 = arith.constant 0 : index
    %2 = vector.load %arg1[%c0_1, %c0_2] : memref<128x128xbf16, #tpu.memory_space<vmem>>, vector<64x128xbf16>
    %c64 = arith.constant 64 : index
    %c0_3 = arith.constant 0 : index
    %3 = vector.load %arg1[%c64, %c0_3] : memref<128x128xbf16, #tpu.memory_space<vmem>>, vector<64x128xbf16>
    %c0_4 = arith.constant 0 : index
    %c0_5 = arith.constant 0 : index
    %4 = vector.load %arg2[%c0_4, %c0_5] : memref<64x64xbf16, #tpu.memory_space<vmem>>, vector<32x64xbf16>
    %c32 = arith.constant 32 : index
    %c0_6 = arith.constant 0 : index
    %5 = vector.load %arg2[%c32, %c0_6] : memref<64x64xbf16, #tpu.memory_space<vmem>>, vector<32x64xbf16>
    %c0_7 = arith.constant 0 : index
    %c0_8 = arith.constant 0 : index
    %6 = vector.load %arg3[%c0_7, %c0_8] : memref<4x128xf32, #tpu.memory_space<vmem>>, vector<1x64xf32>
    %c1 = arith.constant 1 : index
    %c0_9 = arith.constant 0 : index
    %7 = vector.load %arg3[%c1, %c0_9] : memref<4x128xf32, #tpu.memory_space<vmem>>, vector<1x32xf32>
    %c2 = arith.constant 2 : index
    %c0_10 = arith.constant 0 : index
    %8 = vector.load %arg3[%c2, %c0_10] : memref<4x128xf32, #tpu.memory_space<vmem>>, vector<1x64xf32>
    %c3 = arith.constant 3 : index
    %c0_11 = arith.constant 0 : index
    %9 = vector.load %arg3[%c3, %c0_11] : memref<4x128xf32, #tpu.memory_space<vmem>>, vector<1x128xf32>
    %cst = arith.constant dense<0.000000e+00> : vector<16x64xf32>
    %10 = tpu.matmul %1, %2, %cst {dimension_numbers = #tpu.dot_dimension_numbers<[1], [1], [0], [0], [0, 0, 1, 0], [], []>} : vector<16x128xbf16>, vector<64x128xbf16>, vector<16x64xf32> -> vector<16x64xf32>
    %11 = vector.broadcast %6 : vector<1x64xf32> to vector<16x64xf32>
    %12 = arith.addf %10, %11 : vector<16x64xf32>
    %cst_12 = arith.constant 0.000000e+00 : f32
    %13 = vector.broadcast %cst_12 : f32 to vector<16x64xf32>
    %14 = arith.maximumf %12, %13 : vector<16x64xf32>
    %15 = arith.truncf %14 : vector<16x64xf32> to vector<16x64xbf16>
    %cst_13 = arith.constant dense<0.000000e+00> : vector<16x32xf32>
    %16 = tpu.matmul %15, %4, %cst_13 {dimension_numbers = #tpu.dot_dimension_numbers<[1], [1], [0], [0], [0, 0, 1, 0], [], []>} : vector<16x64xbf16>, vector<32x64xbf16>, vector<16x32xf32> -> vector<16x32xf32>
    %17 = vector.broadcast %7 : vector<1x32xf32> to vector<16x32xf32>
    %18 = arith.addf %16, %17 : vector<16x32xf32>
    %cst_14 = arith.constant 0.000000e+00 : f32
    %19 = vector.broadcast %cst_14 : f32 to vector<16x32xf32>
    %20 = arith.maximumf %18, %19 : vector<16x32xf32>
    %21 = arith.truncf %20 : vector<16x32xf32> to vector<16x32xbf16>
    %cst_15 = arith.constant dense<0.000000e+00> : vector<16x64xf32>
    %22 = tpu.matmul %21, %5, %cst_15 {dimension_numbers = #tpu.dot_dimension_numbers<[1], [0], [0], [1], [0, 0, 1, 1], [], []>} : vector<16x32xbf16>, vector<32x64xbf16>, vector<16x64xf32> -> vector<16x64xf32>
    %23 = vector.broadcast %8 : vector<1x64xf32> to vector<16x64xf32>
    %24 = arith.addf %22, %23 : vector<16x64xf32>
    %cst_16 = arith.constant 0.000000e+00 : f32
    %25 = vector.broadcast %cst_16 : f32 to vector<16x64xf32>
    %26 = arith.maximumf %24, %25 : vector<16x64xf32>
    %27 = arith.truncf %26 : vector<16x64xf32> to vector<16x64xbf16>
    %cst_17 = arith.constant dense<0.000000e+00> : vector<16x128xf32>
    %28 = tpu.matmul %27, %3, %cst_17 {dimension_numbers = #tpu.dot_dimension_numbers<[1], [0], [0], [1], [0, 0, 1, 1], [], []>} : vector<16x64xbf16>, vector<64x128xbf16>, vector<16x128xf32> -> vector<16x128xf32>
    %29 = vector.broadcast %9 : vector<1x128xf32> to vector<16x128xf32>
    %30 = arith.addf %28, %29 : vector<16x128xf32>
    %31 = math.tanh %30 : vector<16x128xf32>
    %cst_18 = arith.constant 0.000000e+00 : f32
    %32 = vector.broadcast %cst_18 : f32 to vector<16x96xf32>
    %33 = tpu.concatenate %20, %32, %31 in 1 : vector<16x32xf32>, vector<16x96xf32>, vector<16x128xf32> -> vector<16x256xf32>
    %c0_19 = arith.constant 0 : index
    %c0_20 = arith.constant 0 : index
    %34 = vector.load %arg4[%c0_19, %c0_20] : memref<16x256xf32, #tpu.memory_space<vmem>>, vector<16x256xf32>
    tpu.vector_store %arg4[%c0_19, %c0_20], %33 {strides = array<i32>} : memref<16x256xf32, #tpu.memory_space<vmem>>, vector<16x256xf32>,
    return
  }
}

</mosaic_0001>

<bundles_post_ra>
// kernel: autoencoder_forward.1
= control target key start
LH: loop header
LB: loop body
LE: loop exit
PB: predicated region body
PF: predicated region fallthrough
CT: control target
= control target key end

     0   :  { %9 = vsyncpa [#allocation3], 0  ;;  %s674_s0 = inlined_call_operand.hbm [shape: f32[16,128], index: 0, kind: input, shape index: {}]   ;;  %s675_s1 = inlined_call_operand.hbm [shape: bf16[128,128], index: 1, kind: input, shape index: {}]   ;;  %s676_s2 = inlined_call_operand.hbm [shape: bf16[64,64], index: 2, kind: input, shape index: {}]   ;;  %s677_s3 = inlined_call_operand.vmem [shape: f32[4,128], index: 3, kind: input, shape index: {}]   ;;  %s678_s4 = inlined_call_operand.vmem [shape: f32[16,256], index: 4, kind: output, shape index: {}]  }
   0x1   :  { %10 = vsyncpa [#allocation5], 0  ;;  %s550_s15 = smov [#allocation4]   ;;  %s480_s19 = scalar_lea.hbm %s675_s1, 1024 }
   0x2   :  { %s28_s16 = sshll.u32 %s550_s15, 4  ;;  %p481_p0 = scmp.ne.s32.totalorder %s675_s1, %s480_s19  ;;  %s29_s16 = int_to_ptr.vmem [resolvable:$true] %s28_s16 }
   0x3   :  { %p484_p1 = scmp.lt.u32.totalorder %s480_s19, %s675_s1 }
   0x5   :  { %p486_p2 = pnand %p484_p1, %p481_p0 }
   0x7   :  { %489 = shalt.err (!%p486_p2)
}
   0x8   :  { %s490_s24 = scalar_lea.vmem %s29_s16, 1024  ;;  %p495_p4 = scmp.lt.s32.totalorder %s29_s16, %s29_s16 }
   0x9   :  { %p491_p3 = scmp.ne.s32.totalorder %s29_s16, %s490_s24  ;;  %p496_p5 = scmp.lt.s32.totalorder %s490_s24, %s490_s24 }
   0xb   :  { %p497_p6 = por %p496_p5, %p495_p4 }
   0xd   :  { %p498_p7 = pnand %p497_p6, %p491_p3 }
   0xf   :  { %501 = shalt.err (!%p498_p7)
}
  0x10   :  { %s551_s25 = smov 64   ;;  %s552_s26 = smov 4  }
  0x11   :  { %34 = dma.hbm_to_vmem [thread:$0]  %s675_s1, 1024, %s29_s16, [#allocation5], %s551_s25, %s551_s25, %s552_s26  }
  0x12   :  { %s553_s29 = smov [#allocation2]   ;;  %s502_s7 = scalar_lea.hbm %s674_s0, 256 }
  0x13   :  { %s16_s30 = sshll.u32 %s553_s29, 4  ;;  %p503_p8 = scmp.ne.s32.totalorder %s674_s0, %s502_s7  ;;  %s17_s30 = int_to_ptr.vmem [resolvable:$true] %s16_s30 }
  0x14   :  { %p506_p9 = scmp.lt.u32.totalorder %s502_s7, %s674_s0 }
  0x16   :  { %p508_p10 = pnand %p506_p9, %p503_p8 }
  0x18   :  { %511 = shalt.err (!%p508_p10)
}
  0x19   :  { %s512_s12 = scalar_lea.vmem %s17_s30, 256  ;;  %p517_p12 = scmp.lt.s32.totalorder %s17_s30, %s17_s30 }
  0x1a   :  { %p513_p11 = scmp.ne.s32.totalorder %s17_s30, %s512_s12  ;;  %p518_p13 = scmp.lt.s32.totalorder %s512_s12, %s512_s12 }
  0x1c   :  { %p519_p0 = por %p518_p13, %p517_p12 }
  0x1e   :  { %p520_p1 = pnand %p519_p0, %p513_p11 }
  0x20   :  { %523 = shalt.err (!%p520_p1)
}
  0x21   :  { %s554_s1 = smov 128   ;;  %s555_s13 = smov 8  }
  0x22   :  { %22 = dma.hbm_to_vmem [thread:$0]  %s674_s0, 256, %s17_s30, [#allocation3], %s554_s1, %s554_s1, %s555_s13  }
  0x23   :  { %s556_s16 = smov [#allocation6]   ;;  %s524_s20 = scalar_lea.hbm %s676_s2, 512 }
  0x24   :  { %s40_s17 = sshll.u32 %s556_s16, 4  ;;  %p525_p2 = scmp.ne.s32.totalorder %s676_s2, %s524_s20  ;;  %s41_s17 = int_to_ptr.vmem [resolvable:$true] %s40_s17 }
  0x25   :  { %p528_p3 = scmp.lt.u32.totalorder %s524_s20, %s676_s2 }
  0x27   :  { %p530_p4 = pnand %p528_p3, %p525_p2 }
  0x29   :  { %533 = shalt.err (!%p530_p4)
}
  0x2a   :  { %s534_s27 = scalar_lea.vmem %s41_s17, 512  ;;  %p539_p6 = scmp.lt.s32.totalorder %s41_s17, %s41_s17 }
  0x2b   :  { %p535_p5 = scmp.ne.s32.totalorder %s41_s17, %s534_s27  ;;  %p540_p7 = scmp.lt.s32.totalorder %s534_s27, %s534_s27 }
  0x2d   :  { %p541_p8 = por %p540_p7, %p539_p6 }
  0x2f   :  { %p542_p9 = pnand %p541_p8, %p535_p5 }
  0x31   :  { %545 = shalt.err (!%p542_p9)
}
  0x32   :  { %46 = dma.hbm_to_vmem [thread:$0]  %s676_s2, 512, %s41_s17, [#allocation5], %s551_s25, %s551_s25, %s552_s26  }
  0x33   :  { %546 = dma.done.wait [#allocation3], 256  }
  0x34   :  { %547 = vsyncadd [#allocation3], 4294967040 }
  0x35   :  { %548 = dma.done.wait [#allocation5], 1536  }
  0x36   :  { %549 = vsyncadd [#allocation5], 4294965760  ;;  %v557_v0 = vmov 0.0   ;;  %vm558_vm0 = vmmov 0   ;;  %v464_v1 = vld [vmem:[#allocation4] sm:$0xff]   ;;  %vm176_vm1 = vcmask 523264  }
  0x37   :  { %415 = vmatprep.subr.bf16.mxu0 %v557_v0  ;;  %423 = vmatprep.mubr.msk.bf16.mxu0 %vm558_vm0, %v557_v0  ;;  %v465_v2 = vld [vmem:[#allocation4 + $0x8] sm:$0xff]   ;;  %v468_v3 = vld [vmem:[#allocation6] sm:$0xff]   ;;  %v466_v5 = vld [vmem:[#allocation4 + $0x10] sm:$0xff]   ;;  %vm246_vm2 = vcmask 261120  }
  0x38   :  { %427 = vmatprep.subr.bf16.mxu1 %v557_v0  ;;  %431 = vmatprep.mubr.msk.bf16.mxu1 %vm558_vm0, %v557_v0  ;;  %v181_v4 = vsel %vm176_vm1, %v468_v3, 0  ;;  %v467_v6 = vld [vmem:[#allocation4 + $0x18] sm:$0xff]   ;;  %v59_v7 = vld [vmem:[#allocation2] sm:$0xff]  ;;  %v469_v10 = vld [vmem:[#allocation6 + $0x8] sm:$0xff]  }
  0x39   :  { %416 = vmatpush3.bf16.xpose.msra.mxu0 %v464_v1  ;;  %428 = vmatpush3.bf16.xpose.msra.mxu1 %v181_v4  ;;  %v60_v8 = vld [vmem:[#allocation2 + $0x8] sm:$0xff]  ;;  %v184_v11 = vsel %vm176_vm1, %v469_v10, 0  ;;  %v380_v12 = vld [vmem:[%s677_s3] ss:$0 sm:$0xff]  ;;  %v385_v24 = vld [vmem:[%s677_s3 + $0x1] ss:$0 sm:$0xff] }
  0x3a   :  { %417 = vmatprep.subr.bf16.mxu0 %v557_v0  ;;  %429 = vmatprep.subr.bf16.mxu1 %v557_v0  ;;  %v61_v9 = vpack.c.bf16 %v60_v8, %v59_v7  ;;  %v470_v22 = vld [vmem:[#allocation6 + $0x10] sm:$0xff]   ;;  %v471_v23 = vld [vmem:[#allocation6 + $0x18] sm:$0xff]   ;;  %v472_v34 = vld [vmem:[#allocation4 + $0x20] sm:$0xff]  }
  0x3b   :  { %v473_v37 = vld [vmem:[#allocation4 + $0x28] sm:$0xff]   ;;  %v474_v38 = vld [vmem:[#allocation4 + $0x30] sm:$0xff]   ;;  %v475_v39 = vld [vmem:[#allocation4 + $0x38] sm:$0xff]  }
  0x3c   :  { %v389_v40 = vld [vmem:[%s677_s3 + $0x2] ss:$0 sm:$0xff]  ;;  %v393_v50 = vld [vmem:[%s677_s3 + $0x3] ss:$0 sm:$0xff] }
  0x41   :  { %418 = vmatpush3.bf16.xpose.msra.mxu0 %v465_v2  ;;  %430 = vmatpush3.bf16.xpose.msra.mxu1 %v184_v11 }
  0x42   :  { %419 = vmatprep.subr.bf16.mxu0 %v557_v0  ;;  %435 = vmatprep.subr.bf16.mxu1 %v557_v0 }
  0x49   :  { %420 = vmatpush3.bf16.xpose.msra.mxu0 %v466_v5 }
  0x4a   :  { %421 = vmatprep.subr.bf16.mxu0 %v557_v0 }
  0x51   :  { %422 = vmatpush3.bf16.xpose.msra.mxu0 %v467_v6 }
  0x58   :  { %424 = vmatmul.mubr.bf16.vlgmr.msra.gmra.mrb[0].mxu0 %v61_v9 }
 0x12b   :  { %v152_v13 = vpop.f32.mrb[0].mxu0 }
 0x12c   :  { %v153_v14 = vadd.f32 %v380_v12, %v152_v13  ;;  %v425_v15 = vpop.f32.mrb[1].mxu0 }
 0x12d   :  { %v155_v16 = vpop.f32.mrb[2].mxu0 }
 0x12e   :  { %v156_v17 = vadd.f32 %v380_v12, %v155_v16  ;;  %v426_v18 = vpop.f32.mrb[3].mxu0  ;;  %v159_v19 = vmax.f32 %v153_v14, 0.0 }
 0x130   :  { %v160_v20 = vmax.f32 %v156_v17, 0.0 }
 0x132   :  { %v161_v21 = vpack.c.bf16 %v160_v20, %v159_v19 }
 0x134   :  { %432 = vmatmul.mubr.msk.bf16.vlgmr.msra.gmra.mrb[0].mxu1 %vm176_vm1, %v161_v21 }
 0x135   :  { %439 = vmatprep.mubr.msk.bf16.mxu1 %vm558_vm0, %v557_v0  ;;  %436 = vmatpush3.bf16.msra.mxu1 %v470_v22 }
 0x136   :  { %437 = vmatprep.subr.bf16.mxu1 %v557_v0 }
 0x139   :  { %438 = vmatpush3.bf16.msra.mxu1 %v471_v23 }
 0x13a   :  { %443 = vmatprep.subr.bf16.mxu1 %v557_v0 }
 0x207   :  { %v220_v25 = vpop.f32.mrb[0].mxu1 }
 0x208   :  { %v221_v26 = vadd.f32 %v385_v24, %v220_v25  ;;  %v433_v27 = vpop.f32.mrb[1].mxu1 }
 0x209   :  { %v223_v28 = vpop.f32.mrb[2].mxu1 }
 0x20a   :  { %v227_v29 = vmax.f32 %v221_v26, 0.0  ;;  %v224_v30 = vadd.f32 %v385_v24, %v223_v28  ;;  %v434_v31 = vpop.f32.mrb[3].mxu1 }
 0x20c   :  { %v368_v32 = vsel %vm246_vm2, %v227_v29, 0.0  ;;  %v228_v33 = vmax.f32 %v224_v30, 0.0 }
 0x20d   :  { %370 = vst [vmem:[%s678_s4] sm:$0xff] %v368_v32 }
 0x20e   :  { %v229_v35 = vpack.c.bf16 %v228_v33, %v227_v29  ;;  %v369_v36 = vsel %vm246_vm2, %v228_v33, 0.0 }
 0x20f   :  { %372 = vst [vmem:[%s678_s4 + $0x10] sm:$0xff] %v369_v36 }
 0x210   :  { %440 = vmatmul.mubr.msk.bf16.vlgmr.msra.gmra.mrb[4].mxu1 %vm246_vm2, %v229_v35 }
 0x211   :  { %444 = vmatpush3.bf16.msra.mxu1 %v472_v34  ;;  %451 = vmatprep.mubr.msk.bf16.mxu1 %vm558_vm0, %v557_v0 }
 0x212   :  { %445 = vmatprep.subr.bf16.mxu1 %v557_v0 }
 0x215   :  { %446 = vmatpush3.bf16.msra.mxu1 %v473_v37 }
 0x216   :  { %447 = vmatprep.subr.bf16.mxu1 %v557_v0 }
 0x219   :  { %448 = vmatpush3.bf16.msra.mxu1 %v474_v38 }
 0x21a   :  { %449 = vmatprep.subr.bf16.mxu1 %v557_v0 }
 0x21d   :  { %450 = vmatpush3.bf16.msra.mxu1 %v475_v39 }
 0x2e3   :  { %v284_v41 = vpop.f32.mrb[4].mxu1 }
 0x2e4   :  { %v285_v42 = vadd.f32 %v389_v40, %v284_v41  ;;  %v441_v43 = vpop.f32.mrb[5].mxu1 }
 0x2e5   :  { %v287_v44 = vpop.f32.mrb[6].mxu1 }
 0x2e6   :  { %v288_v45 = vadd.f32 %v389_v40, %v287_v44  ;;  %v442_v46 = vpop.f32.mrb[7].mxu1  ;;  %v291_v47 = vmax.f32 %v285_v42, 0.0 }
 0x2e8   :  { %v292_v48 = vmax.f32 %v288_v45, 0.0 }
 0x2ea   :  { %v293_v49 = vpack.c.bf16 %v292_v48, %v291_v47 }
 0x2ec   :  { %452 = vmatmul.mubr.msk.bf16.vlgmr.msra.gmra.mrb[8].mxu1 %vm176_vm1, %v293_v49 }
 0x3bf   :  { %v359_v51 = vpop.f32.mrb[8].mxu1 }
 0x3c0   :  { %v360_v52 = vadd.f32 %v393_v50, %v359_v51  ;;  %v453_v53 = vpop.f32.mrb[9].mxu1 }
 0x3c1   :  { %v362_v54 = vpop.f32.mrb[10].mxu1 }
 0x3c2   :  { %476 = vtanh.f32 %v360_v52  ;;  %v363_v55 = vadd.f32 %v393_v50, %v362_v54  ;;  %v454_v56 = vpop.f32.mrb[11].mxu1 }
 0x3c4   :  { %478 = vtanh.f32 %v363_v55 }
 0x3cc   :  { %v477_v57 = vpop.eup %476 }
 0x3cd   :  { %371 = vst [vmem:[%s678_s4 + $0x8] sm:$0xff] %v477_v57 }
 0x3ce   :  { %v479_v58 = vpop.eup %478 }
 0x3cf   :  { %373 = vst [vmem:[%s678_s4 + $0x18] sm:$0xff] %v479_v58 }
 0x3d0   :  { %378 = vsyncpa [#allocation3], 1 }
 0x3d1   :  { %379 = vsyncpa [#allocation5], 1 }

</bundles_post_ra>
